<compile_context>
chip_gen: v7x
topology: tpu7x:2x2x1
jax: 0.10.0
libtpu: 0.0.40
codegen_flags: <defaults>
</compile_context>

<pallas_src>
import functools

import jax
import jax.numpy as jnp
from jax.experimental import pallas as pl
from jax.experimental.pallas import tpu as pltpu


def _round_up(x: int, m: int) -> int:
    return ((x + m - 1) // m) * m


def _cdiv(a: int, b: int) -> int:
    return -(-a // b)


def _pad_dim(d: int) -> int:
    # v6e/v7x MXU is 2x 256x256: pad to 256 only when the dim is already >= 256,
    # otherwise 128 (padding a 64-wide layer to 256 would just waste FLOPs).
    return _round_up(d, 256 if d >= 256 else 128)


def _mlp_fused_kernel(num_layers, x_ref, *refs):
    """refs = (w0, b0, w1, b1, ..., o_ref). Entire layer stack computed in-VMEM."""
    o_ref = refs[-1]
    layer_refs = refs[:-1]
    h = x_ref[...]  # already in the matmul compute dtype (bf16 by default)
    for layer in range(num_layers):  # static unroll over the fixed layer list
        w_ref = layer_refs[2 * layer]
        b_ref = layer_refs[2 * layer + 1]
        lhs = h if h.dtype == w_ref.dtype else h.astype(w_ref.dtype)
        # MXU matmul in the weight dtype (bf16/f32) with f32 accumulation.
        y = jnp.dot(lhs, w_ref[...], preferred_element_type=jnp.float32)
        # Bias + ReLU fused on the f32 accumulator tile (VPU filler under MXU).
        h = jnp.maximum(y + b_ref[...], 0.0)
    o_ref[...] = h.astype(o_ref.dtype)


def prepare_mlp_params(params, compute_dtype=jnp.bfloat16):
    """One-time prep (== module init): transpose torch-layout W (out,in) -> (in,out),
    zero-pad feature dims to lane-dense multiples (128, or 256 when dim >= 256),
    cast weights to the matmul compute dtype (bf16 default). Biases stay f32 since
    the bias+ReLU epilogue runs in f32."""
    prepped = []
    for w, b in params:
        out_f, in_f = w.shape
        in_pad, out_pad = _pad_dim(in_f), _pad_dim(out_f)
        w_t = jnp.zeros((in_pad, out_pad), compute_dtype)
        w_t = w_t.at[:in_f, :out_f].set(jnp.asarray(w).T.astype(compute_dtype))
        b_p = jnp.zeros((1, out_pad), jnp.float32)
        b_p = b_p.at[:, :out_f].set(jnp.asarray(b).astype(jnp.float32))
        prepped.append((w_t, b_p))
    return prepped


def _pick_batch_tile(batch: int, compute_itemsize: int) -> int:
    if batch < 16:
        return _round_up(batch, 8)
    # Split into >= 2 grid steps so both v7x TensorCores get work; big tiles
    # amortize the ~0.35 us per-step overhead. Cap at 512 rows for bf16 weights,
    # 256 for f32 (accumulator/VMEM pressure).
    cap = 512 if compute_itemsize <= 2 else 256
    return min(_round_up(_cdiv(batch, 2), 8), cap)


@functools.partial(jax.jit, static_argnames=("out_features",))
def mlp_forward(x, prepped_params, *, out_features):
    """MLP forward: one fused Pallas kernel over the whole (Linear+ReLU)* stack."""
    batch, in_f = x.shape
    num_layers = len(prepped_params)
    compute_dtype = prepped_params[0][0].dtype
    cbytes = jnp.dtype(compute_dtype).itemsize
    in_p = prepped_params[0][0].shape[0]
    out_p = prepped_params[-1][0].shape[1]
    out_dtype = x.dtype

    tb = _pick_batch_tile(batch, cbytes)
    # Only tiny batches (batch < tb) get row padding; otherwise the ragged last
    # grid step computes garbage rows whose stores Pallas masks out.
    b_rows = max(batch, tb)

    needs_pad = (b_rows != batch) or (in_p != in_f)
    if needs_pad:
        # Feature (K) columns MUST be zero-filled: padded weight rows are zero, so
        # zero inputs keep valid rows exact. Padded batch rows are sliced off.
        x_p = jnp.zeros((b_rows, in_p), compute_dtype)
        x_p = x_p.at[:batch, :in_f].set(x.astype(compute_dtype))
    else:
        x_p = x.astype(compute_dtype)

    flat_args = []
    in_specs = [pl.BlockSpec((tb, in_p), lambda i: (i, 0))]
    weight_bytes = 0
    for w_t, b in prepped_params:
        flat_args += [w_t, b]
        weight_bytes += (w_t.size * w_t.dtype.itemsize + b.size * b.dtype.itemsize)
        # Constant index_map -> single buffer: default double-buffering would just
        # duplicate every weight in VMEM with zero pipelining benefit.
        in_specs.append(pl.BlockSpec(w_t.shape, lambda i: (0, 0),
                                     pipeline_mode=pl.Buffered(1)))
        in_specs.append(pl.BlockSpec(b.shape, lambda i: (0, 0),
                                     pipeline_mode=pl.Buffered(1)))

    # Explicit VMEM budget: resident weights + double-buffered x/out tiles + two
    # live f32 activation tiles, with ~25% headroom. Clamp to a range valid on
    # every TPU generation (v5e scoped default 16 MiB, v7x physical 64 MiB).
    max_dim = max([in_p] + [w.shape[1] for w, _ in prepped_params])
    io_bytes = 2 * tb * in_p * cbytes + 2 * tb * out_p * jnp.dtype(out_dtype).itemsize
    act_bytes = 2 * tb * max_dim * 4
    vmem_limit = int((weight_bytes + io_bytes + act_bytes) * 1.25) + (2 << 20)
    vmem_limit = min(max(vmem_limit, 16 << 20), 64 << 20)

    out = pl.pallas_call(
        functools.partial(_mlp_fused_kernel, num_layers),
        out_shape=jax.ShapeDtypeStruct((b_rows, out_p), out_dtype),
        grid=(_cdiv(b_rows, tb),),
        in_specs=in_specs,
        out_specs=pl.BlockSpec((tb, out_p), lambda i: (i, 0)),
        compiler_params=pltpu.CompilerParams(
            dimension_semantics=("parallel",),
            vmem_limit_bytes=vmem_limit),
    )(x_p, *flat_args)

    return out[:batch, :out_features]


def init_mlp_params(key, in_size, layer_sizes, dtype=jnp.float32):
    """Deterministic params matching torch.nn.Linear shapes (W: (out,in), b: (out,))."""
    params = []
    prev = in_size
    for out in layer_sizes:
        key, kw, kb = jax.random.split(key, 3)
        bound = 1.0 / jnp.sqrt(prev)  # torch Linear default init range
        w = jax.random.uniform(kw, (out, prev), dtype, -bound, bound)
        b = jax.random.uniform(kb, (out,), dtype, -bound, bound)
        params.append((w, b))
        prev = out
    return params


def mlp_reference(x, params):
    for w, b in params:
        x = jnp.maximum(x @ w.T + b, 0.0)
    return x


if __name__ == "__main__":
    key = jax.random.PRNGKey(0)
    in_size = 32
    layer_sizes = [64, 32, 16]

    kx, kp, kx2 = jax.random.split(key, 3)
    params = init_mlp_params(kp, in_size, layer_sizes)

    # Small batch (single padded tile).
    batch = 8
    x = jax.random.normal(kx, (batch, in_size), jnp.float32)
    ref = mlp_reference(x, params)

    # f32 operand path: matches the PyTorch module's default dtype exactly.
    prepped_f32 = prepare_mlp_params(params, jnp.float32)
    out = jax.block_until_ready(
        mlp_forward(x, prepped_f32, out_features=layer_sizes[-1]))
    assert out.shape == (batch, layer_sizes[-1])
    assert jnp.allclose(out, ref, atol=1e-5, rtol=1e-5)

    # bf16 operand path (default; f32 accumulate). Rounding compounds with depth,
    # hence the looser tolerance.
    prepped_bf16 = prepare_mlp_params(params)  # bf16 default
    out_bf16 = jax.block_until_ready(
        mlp_forward(x, prepped_bf16, out_features=layer_sizes[-1]))
    assert jnp.allclose(out_bf16, ref, atol=5e-2, rtol=5e-2)

    # Ragged batch (>= 16): grid of 2 "parallel" steps, last tile partially masked.
    batch2 = 20
    x2 = jax.random.normal(kx2, (batch2, in_size), jnp.float32)
    ref2 = mlp_reference(x2, params)
    out2 = jax.block_until_ready(
        mlp_forward(x2, prepped_bf16, out_features=layer_sizes[-1]))
    assert out2.shape == (batch2, layer_sizes[-1])
    assert jnp.allclose(out2, ref2, atol=5e-2, rtol=5e-2)

    print("KERNEL_OK")
</pallas_src>

<mosaic_0001>
module attributes {stable_mosaic.version = 11 : i64} {
  func.func @_mlp_fused_kernel(%arg0: i32, %arg1: memref<8x128xf32, #tpu.memory_space<vmem>>, %arg2: memref<128x128xf32, #tpu.memory_space<vmem>>, %arg3: memref<1x128xf32, #tpu.memory_space<vmem>>, %arg4: memref<128x128xf32, #tpu.memory_space<vmem>>, %arg5: memref<1x128xf32, #tpu.memory_space<vmem>>, %arg6: memref<128x128xf32, #tpu.memory_space<vmem>>, %arg7: memref<1x128xf32, #tpu.memory_space<vmem>>, %arg8: memref<8x128xf32, #tpu.memory_space<vmem>>) attributes {dimension_semantics = [#tpu.dimension_semantics<parallel>], iteration_bounds = array<i64: 1>, scalar_prefetch = 0 : i64, scratch_operands = 0 : i64, tpu.core_type = #tpu.core_type<tc>, window_params = [{transform_indices = @transform_0, window_bounds = array<i64: 8, 128>}, {pipeline_mode = #tpu.pipeline_mode<synchronous>, transform_indices = @transform_1, window_bounds = array<i64: 128, 128>}, {pipeline_mode = #tpu.pipeline_mode<synchronous>, transform_indices = @transform_2, window_bounds = array<i64: 1, 128>}, {pipeline_mode = #tpu.pipeline_mode<synchronous>, transform_indices = @transform_3, window_bounds = array<i64: 128, 128>}, {pipeline_mode = #tpu.pipeline_mode<synchronous>, transform_indices = @transform_4, window_bounds = array<i64: 1, 128>}, {pipeline_mode = #tpu.pipeline_mode<synchronous>, transform_indices = @transform_5, window_bounds = array<i64: 128, 128>}, {pipeline_mode = #tpu.pipeline_mode<synchronous>, transform_indices = @transform_6, window_bounds = array<i64: 1, 128>}, {transform_indices = @transform_7, window_bounds = array<i64: 8, 128>}]} {
    %c0 = arith.constant 0 : index
    %c0_0 = arith.constant 0 : index
    %0 = vector.load %arg1[%c0, %c0_0] : memref<8x128xf32, #tpu.memory_space<vmem>>, vector<8x128xf32>
    %c0_1 = arith.constant 0 : index
    %c0_2 = arith.constant 0 : index
    %1 = vector.load %arg2[%c0_1, %c0_2] : memref<128x128xf32, #tpu.memory_space<vmem>>, vector<128x128xf32>
    %cst = arith.constant dense<0.000000e+00> : vector<8x128xf32>
    %2 = tpu.matmul %0, %1, %cst {dimension_numbers = #tpu.dot_dimension_numbers<[1], [0], [0], [1], [0, 0, 1, 1], [], []>} : vector<8x128xf32>, vector<128x128xf32>, vector<8x128xf32> -> vector<8x128xf32>
    %c0_3 = arith.constant 0 : index
    %c0_4 = arith.constant 0 : index
    %3 = vector.load %arg3[%c0_3, %c0_4] : memref<1x128xf32, #tpu.memory_space<vmem>>, vector<1x128xf32>
    %4 = vector.broadcast %3 : vector<1x128xf32> to vector<8x128xf32>
    %5 = arith.addf %2, %4 : vector<8x128xf32>
    %cst_5 = arith.constant 0.000000e+00 : f32
    %6 = vector.broadcast %cst_5 : f32 to vector<8x128xf32>
    %7 = arith.maximumf %5, %6 : vector<8x128xf32>
    %c0_6 = arith.constant 0 : index
    %c0_7 = arith.constant 0 : index
    %8 = vector.load %arg4[%c0_6, %c0_7] : memref<128x128xf32, #tpu.memory_space<vmem>>, vector<128x128xf32>
    %cst_8 = arith.constant dense<0.000000e+00> : vector<8x128xf32>
    %9 = tpu.matmul %7, %8, %cst_8 {dimension_numbers = #tpu.dot_dimension_numbers<[1], [0], [0], [1], [0, 0, 1, 1], [], []>} : vector<8x128xf32>, vector<128x128xf32>, vector<8x128xf32> -> vector<8x128xf32>
    %c0_9 = arith.constant 0 : index
    %c0_10 = arith.constant 0 : index
    %10 = vector.load %arg5[%c0_9, %c0_10] : memref<1x128xf32, #tpu.memory_space<vmem>>, vector<1x128xf32>
    %11 = vector.broadcast %10 : vector<1x128xf32> to vector<8x128xf32>
    %12 = arith.addf %9, %11 : vector<8x128xf32>
    %cst_11 = arith.constant 0.000000e+00 : f32
    %13 = vector.broadcast %cst_11 : f32 to vector<8x128xf32>
    %14 = arith.maximumf %12, %13 : vector<8x128xf32>
    %c0_12 = arith.constant 0 : index
    %c0_13 = arith.constant 0 : index
    %15 = vector.load %arg6[%c0_12, %c0_13] : memref<128x128xf32, #tpu.memory_space<vmem>>, vector<128x128xf32>
    %cst_14 = arith.constant dense<0.000000e+00> : vector<8x128xf32>
    %16 = tpu.matmul %14, %15, %cst_14 {dimension_numbers = #tpu.dot_dimension_numbers<[1], [0], [0], [1], [0, 0, 1, 1], [], []>} : vector<8x128xf32>, vector<128x128xf32>, vector<8x128xf32> -> vector<8x128xf32>
    %c0_15 = arith.constant 0 : index
    %c0_16 = arith.constant 0 : index
    %17 = vector.load %arg7[%c0_15, %c0_16] : memref<1x128xf32, #tpu.memory_space<vmem>>, vector<1x128xf32>
    %18 = vector.broadcast %17 : vector<1x128xf32> to vector<8x128xf32>
    %19 = arith.addf %16, %18 : vector<8x128xf32>
    %cst_17 = arith.constant 0.000000e+00 : f32
    %20 = vector.broadcast %cst_17 : f32 to vector<8x128xf32>
    %21 = arith.maximumf %19, %20 : vector<8x128xf32>
    %c0_18 = arith.constant 0 : index
    %c0_19 = arith.constant 0 : index
    %22 = vector.load %arg8[%c0_18, %c0_19] : memref<8x128xf32, #tpu.memory_space<vmem>>, vector<8x128xf32>
    tpu.vector_store %arg8[%c0_18, %c0_19], %21 {strides = array<i32>} : memref<8x128xf32, #tpu.memory_space<vmem>>, vector<8x128xf32>,
    return
  }
  func.func @transform_0(%arg0: i32) -> (i32, i32) {
    %c0_i32 = arith.constant 0 : i32
    %c0_i32_0 = arith.constant 0 : i32
    return %arg0, %c0_i32 : i32, i32
  }
  func.func @transform_1(%arg0: i32) -> (i32, i32) {
    %c0_i32 = arith.constant 0 : i32
    %c0_i32_0 = arith.constant 0 : i32
    %c0_i32_1 = arith.constant 0 : i32
    return %c0_i32, %c0_i32_0 : i32, i32
  }
  func.func @transform_2(%arg0: i32) -> (i32, i32) {
    %c0_i32 = arith.constant 0 : i32
    %c0_i32_0 = arith.constant 0 : i32
    %c0_i32_1 = arith.constant 0 : i32
    return %c0_i32, %c0_i32_0 : i32, i32
  }
  func.func @transform_3(%arg0: i32) -> (i32, i32) {
    %c0_i32 = arith.constant 0 : i32
    %c0_i32_0 = arith.constant 0 : i32
    %c0_i32_1 = arith.constant 0 : i32
    return %c0_i32, %c0_i32_0 : i32, i32
  }
  func.func @transform_4(%arg0: i32) -> (i32, i32) {
    %c0_i32 = arith.constant 0 : i32
    %c0_i32_0 = arith.constant 0 : i32
    %c0_i32_1 = arith.constant 0 : i32
    return %c0_i32, %c0_i32_0 : i32, i32
  }
  func.func @transform_5(%arg0: i32) -> (i32, i32) {
    %c0_i32 = arith.constant 0 : i32
    %c0_i32_0 = arith.constant 0 : i32
    %c0_i32_1 = arith.constant 0 : i32
    return %c0_i32, %c0_i32_0 : i32, i32
  }
  func.func @transform_6(%arg0: i32) -> (i32, i32) {
    %c0_i32 = arith.constant 0 : i32
    %c0_i32_0 = arith.constant 0 : i32
    %c0_i32_1 = arith.constant 0 : i32
    return %c0_i32, %c0_i32_0 : i32, i32
  }
  func.func @transform_7(%arg0: i32) -> (i32, i32) {
    %c0_i32 = arith.constant 0 : i32
    %c0_i32_0 = arith.constant 0 : i32
    return %arg0, %c0_i32 : i32, i32
  }
}

</mosaic_0001>

<bundles_post_ra>
// kernel: mlp_forward.1
= control target key start
LH: loop header
LB: loop body
LE: loop exit
PB: predicated region body
PF: predicated region fallthrough
CT: control target
= control target key end

     0   :  { %12 = vsyncpa [#allocation3], 0  ;;  %s857_s0 = inlined_call_operand.vmem [shape: f32[8,128], index: 0, kind: input, shape index: {}]   ;;  %s858_s1 = inlined_call_operand.hbm [shape: f32[128,128], index: 1, kind: input, shape index: {}]   ;;  %s859_s2 = inlined_call_operand.vmem [shape: f32[1,128], index: 2, kind: input, shape index: {}]   ;;  %s860_s3 = inlined_call_operand.hbm [shape: f32[128,128], index: 3, kind: input, shape index: {}]   ;;  %s861_s4 = inlined_call_operand.vmem [shape: f32[1,128], index: 4, kind: input, shape index: {}]   ;;  %s862_s5 = inlined_call_operand.hbm [shape: f32[128,128], index: 5, kind: input, shape index: {}]   ;;  %s863_s6 = inlined_call_operand.vmem [shape: f32[1,128], index: 6, kind: input, shape index: {}]   ;;  %s864_s7 = inlined_call_operand.hbm [shape: f32[8,128], index: 7, kind: output, shape index: {}]  }
   0x1   :  { %13 = vsyncpa [#allocation6], 0 }
   0x2   :  { %14 = vsyncpa [#allocation4], 0  ;;  %s702_s24 = smov [#allocation5]   ;;  %s703_s26 = smov [#allocation2]  }
   0x3   :  { %s36_s25 = sshll.u32 %s702_s24, 4  ;;  %s22_s27 = sshll.u32 %s703_s26, 4  ;;  %s37_s25 = int_to_ptr.vmem [resolvable:$true] %s36_s25  ;;  %s751_s27 = int_to_ptr.vmem [resolvable:$true] %s22_s27 }
   0x4   :  { %s608_s30 = scalar_lea.hbm %s860_s3, 2048 }
   0x5   :  { %p609_p0 = scmp.ne.s32.totalorder %s860_s3, %s608_s30  ;;  %p612_p1 = scmp.lt.u32.totalorder %s608_s30, %s860_s3 }
   0x7   :  { %p614_p2 = pnand %p612_p1, %p609_p0 }
   0x9   :  { %617 = shalt.err (!%p614_p2)
}
   0xa   :  { %s618_s12 = scalar_lea.vmem %s37_s25, 2048  ;;  %p623_p4 = scmp.lt.s32.totalorder %s37_s25, %s37_s25 }
   0xb   :  { %p619_p3 = scmp.ne.s32.totalorder %s37_s25, %s618_s12  ;;  %p624_p5 = scmp.lt.s32.totalorder %s618_s12, %s618_s12 }
   0xd   :  { %p625_p6 = por %p624_p5, %p623_p4 }
   0xf   :  { %p626_p7 = pnand %p625_p6, %p619_p3 }
  0x11   :  { %629 = shalt.err (!%p626_p7)
}
  0x12   :  { %s704_s13 = smov 128   ;;  %s705_s14 = smov 8  }
  0x13   :  { %42 = dma.hbm_to_vmem [thread:$0]  %s860_s3, 2048, %s37_s25, [#allocation6], %s704_s13, %s704_s13, %s705_s14  }
  0x14   :  { %s630_s19 = scalar_lea.hbm %s858_s1, 2048 }
  0x15   :  { %p631_p8 = scmp.ne.s32.totalorder %s858_s1, %s630_s19  ;;  %p634_p9 = scmp.lt.u32.totalorder %s630_s19, %s858_s1 }
  0x17   :  { %p636_p10 = pnand %p634_p9, %p631_p8 }
  0x19   :  { %639 = shalt.err (!%p636_p10)
}
  0x1a   :  { %s640_s24 = scalar_lea.vmem %s751_s27, 2048  ;;  %p645_p12 = scmp.lt.s32.totalorder %s751_s27, %s751_s27 }
  0x1b   :  { %p641_p11 = scmp.ne.s32.totalorder %s751_s27, %s640_s24  ;;  %p646_p13 = scmp.lt.s32.totalorder %s640_s24, %s640_s24 }
  0x1d   :  { %p647_p0 = por %p646_p13, %p645_p12 }
  0x1f   :  { %p648_p1 = pnand %p647_p0, %p641_p11 }
  0x21   :  { %651 = shalt.err (!%p648_p1)
}
  0x22   :  { %28 = dma.hbm_to_vmem [thread:$0]  %s858_s1, 2048, %s751_s27, [#allocation3], %s704_s13, %s704_s13, %s705_s14  }
  0x23   :  { %s706_s26 = smov [#allocation7]   ;;  %s652_s8 = scalar_lea.hbm %s862_s5, 2048 }
  0x24   :  { %s50_s28 = sshll.u32 %s706_s26, 4  ;;  %p653_p2 = scmp.ne.s32.totalorder %s862_s5, %s652_s8  ;;  %s51_s28 = int_to_ptr.vmem [resolvable:$true] %s50_s28 }
  0x25   :  { %p656_p3 = scmp.lt.u32.totalorder %s652_s8, %s862_s5 }
  0x27   :  { %p658_p4 = pnand %p656_p3, %p653_p2 }
  0x29   :  { %661 = shalt.err (!%p658_p4)
}
  0x2a   :  { %s662_s15 = scalar_lea.vmem %s51_s28, 2048  ;;  %p667_p6 = scmp.lt.s32.totalorder %s51_s28, %s51_s28 }
  0x2b   :  { %p663_p5 = scmp.ne.s32.totalorder %s51_s28, %s662_s15  ;;  %p668_p7 = scmp.lt.s32.totalorder %s662_s15, %s662_s15 }
  0x2d   :  { %p669_p8 = por %p668_p7, %p667_p6 }
  0x2f   :  { %p670_p9 = pnand %p669_p8, %p663_p5 }
  0x31   :  { %673 = shalt.err (!%p670_p9)
}
  0x32   :  { %56 = dma.hbm_to_vmem [thread:$0]  %s862_s5, 2048, %s51_s28, [#allocation6], %s704_s13, %s704_s13, %s705_s14  }
  0x33   :  { %696 = dma.done.wait [#allocation3], 2048  }
  0x34   :  { %697 = vsyncadd [#allocation3], 4294965248 }
  0x35   :  { %698 = dma.done.wait [#allocation6], 4096  }
  0x36   :  { %699 = vsyncadd [#allocation6], 4294963200  ;;  %v707_v0 = vmov 0.0|0.0   ;;  %vm708_vm0 = vmmov 0   ;;  %v709_v1 = vmov 0.0   ;;  %v69_v2 = vld [vmem:[#allocation2] sm:$0xff] }
  0x37   :  { %527 = vmatprep.subr.bf16.mxu0 %v707_v0  ;;  %454 = vmatprep.mubr.msk.f32.mxu0 %vm708_vm0, %v709_v1  ;;  %v70_v3 = vld [vmem:[#allocation2 + $0x8] sm:$0xff]  ;;  %v71_v4 = vld [vmem:[#allocation2 + $0x10] sm:$0xff]  ;;  %v72_v6 = vld [vmem:[#allocation2 + $0x18] sm:$0xff]  ;;  %s710_s19 = smov [#allocation8]  }
  0x38   :  { %551 = vmatprep.subr.bf16.mxu1 %v707_v0  ;;  %489 = vmatprep.mubr.msk.f32.mxu1 %vm708_vm0, %v709_v1  ;;  %v528_v5 = vpack.c.bf16 %v70_v3, %v69_v2  ;;  %v531_v7 = vpack.c.bf16 %v72_v6, %v71_v4  ;;  %v73_v8 = vld [vmem:[#allocation2 + $0x20] sm:$0xff]  ;;  %v74_v9 = vld [vmem:[#allocation2 + $0x28] sm:$0xff]  ;;  %v165_v12 = vld [vmem:[#allocation5 + $0x10] sm:$0xff]  ;;  %s358_s20 = sshll.u32 %s710_s19, 4  ;;  %s359_s20 = int_to_ptr.vmem [resolvable:$true] %s358_s20 }
  0x39   :  { %v163_v10 = vld [vmem:[#allocation5] sm:$0xff]  ;;  %v164_v11 = vld [vmem:[#allocation5 + $0x8] sm:$0xff]  ;;  %v166_v13 = vld [vmem:[#allocation5 + $0x18] sm:$0xff]  ;;  %v534_v14 = vpack.c.bf16 %v74_v9, %v73_v8  ;;  %s674_s21 = scalar_lea.vmem %s359_s20, 128  ;;  %p679_p11 = scmp.lt.s32.totalorder %s359_s20, %s359_s20 }
  0x3a   :  { %529 = vmatpush3.bf16.msra.mxu0 %v528_v5  ;;  %v552_v15 = vpack.c.bf16 %v164_v11, %v163_v10  ;;  %v75_v16 = vld [vmem:[#allocation2 + $0x30] sm:$0xff]  ;;  %v76_v17 = vld [vmem:[#allocation2 + $0x38] sm:$0xff]  ;;  %v555_v18 = vpack.c.bf16 %v166_v13, %v165_v12  ;;  %v167_v19 = vld [vmem:[#allocation5 + $0x20] sm:$0xff]  ;;  %p675_p10 = scmp.ne.s32.totalorder %s359_s20, %s674_s21  ;;  %p680_p12 = scmp.lt.s32.totalorder %s674_s21, %s674_s21 }
  0x3b   :  { %530 = vmatprep.subr.bf16.mxu0 %v707_v0  ;;  %v168_v20 = vld [vmem:[#allocation5 + $0x28] sm:$0xff]  ;;  %v537_v21 = vpack.c.bf16 %v76_v17, %v75_v16  ;;  %v77_v22 = vld [vmem:[#allocation2 + $0x40] sm:$0xff]  ;;  %v169_v25 = vld [vmem:[#allocation5 + $0x30] sm:$0xff] }
  0x3c   :  { %553 = vmatpush3.bf16.msra.mxu1 %v552_v15  ;;  %v78_v23 = vld [vmem:[#allocation2 + $0x48] sm:$0xff]  ;;  %v558_v24 = vpack.c.bf16 %v168_v20, %v167_v19  ;;  %v170_v26 = vld [vmem:[#allocation5 + $0x38] sm:$0xff]  ;;  %v79_v28 = vld [vmem:[#allocation2 + $0x50] sm:$0xff]  ;;  %p681_p13 = por %p680_p12, %p679_p11 }
  0x3d   :  { %554 = vmatprep.subr.bf16.mxu1 %v707_v0  ;;  %v540_v27 = vpack.c.bf16 %v78_v23, %v77_v22  ;;  %v80_v29 = vld [vmem:[#allocation2 + $0x58] sm:$0xff]  ;;  %v561_v30 = vpack.c.bf16 %v170_v26, %v169_v25  ;;  %v171_v31 = vld [vmem:[#allocation5 + $0x40] sm:$0xff]  ;;  %v172_v32 = vld [vmem:[#allocation5 + $0x48] sm:$0xff] }
  0x3e   :  { %532 = vmatpush3.bf16.msra.mxu0 %v531_v7  ;;  %v543_v33 = vpack.c.bf16 %v80_v29, %v79_v28  ;;  %v81_v34 = vld [vmem:[#allocation2 + $0x60] sm:$0xff]  ;;  %v82_v35 = vld [vmem:[#allocation2 + $0x68] sm:$0xff]  ;;  %v564_v36 = vpack.c.bf16 %v172_v32, %v171_v31  ;;  %v173_v37 = vld [vmem:[#allocation5 + $0x50] sm:$0xff]  ;;  %p682_p0 = pnand %p681_p13, %p675_p10 }
  0x3f   :  { %533 = vmatprep.subr.bf16.mxu0 %v707_v0  ;;  %v174_v38 = vld [vmem:[#allocation5 + $0x58] sm:$0xff]  ;;  %v546_v39 = vpack.c.bf16 %v82_v35, %v81_v34  ;;  %v83_v40 = vld [vmem:[#allocation2 + $0x70] sm:$0xff]  ;;  %v175_v43 = vld [vmem:[#allocation5 + $0x60] sm:$0xff] }
  0x40   :  { %556 = vmatpush3.bf16.msra.mxu1 %v555_v18  ;;  %v84_v41 = vld [vmem:[#allocation2 + $0x78] sm:$0xff]  ;;  %v567_v42 = vpack.c.bf16 %v174_v38, %v173_v37  ;;  %v176_v44 = vld [vmem:[#allocation5 + $0x68] sm:$0xff]  ;;  %v68_v47 = vld [vmem:[%s857_s0] sm:$0xff] }
  0x41   :  { %557 = vmatprep.subr.bf16.mxu1 %v707_v0  ;;  %v549_v45 = vpack.c.bf16 %v84_v41, %v83_v40  ;;  %v570_v46 = vpack.c.bf16 %v176_v44, %v175_v43  ;;  %v177_v48 = vld [vmem:[#allocation5 + $0x70] sm:$0xff]  ;;  %v178_v49 = vld [vmem:[#allocation5 + $0x78] sm:$0xff]  ;;  %v257_v51 = vld [vmem:[#allocation7] sm:$0xff] }
  0x42   :  { %535 = vmatpush3.bf16.msra.mxu0 %v534_v14  ;;  %v573_v50 = vpack.c.bf16 %v178_v49, %v177_v48  ;;  %v258_v52 = vld [vmem:[#allocation7 + $0x8] sm:$0xff]  ;;  %v259_v53 = vld [vmem:[#allocation7 + $0x10] sm:$0xff]  ;;  %v260_v55 = vld [vmem:[#allocation7 + $0x18] sm:$0xff] }
  0x43   :  { %536 = vmatprep.subr.bf16.mxu0 %v707_v0  ;;  %v576_v54 = vpack.c.bf16 %v258_v52, %v257_v51  ;;  %v579_v56 = vpack.c.bf16 %v260_v55, %v259_v53  ;;  %v261_v57 = vld [vmem:[#allocation7 + $0x20] sm:$0xff]  ;;  %v262_v58 = vld [vmem:[#allocation7 + $0x28] sm:$0xff]  ;;  %v263_v60 = vld [vmem:[#allocation7 + $0x30] sm:$0xff] }
  0x44   :  { %559 = vmatpush3.bf16.msra.mxu1 %v558_v24  ;;  %v582_v59 = vpack.c.bf16 %v262_v58, %v261_v57  ;;  %v264_v61 = vld [vmem:[#allocation7 + $0x38] sm:$0xff]  ;;  %v265_v63 = vld [vmem:[#allocation7 + $0x40] sm:$0xff]  ;;  %v267_v3 = vld [vmem:[#allocation7 + $0x50] sm:$0xff] }
  0x45   :  { %560 = vmatprep.subr.bf16.mxu1 %v707_v0  ;;  %v585_v62 = vpack.c.bf16 %v264_v61, %v263_v60  ;;  %v268_v4 = vld [vmem:[#allocation7 + $0x58] sm:$0xff]  ;;  %v269_v6 = vld [vmem:[#allocation7 + $0x60] sm:$0xff]  ;;  %v270_v7 = vld [vmem:[#allocation7 + $0x68] sm:$0xff] }
  0x46   :  { %538 = vmatpush3.bf16.msra.mxu0 %v537_v21  ;;  %v591_v5 = vpack.c.bf16 %v268_v4, %v267_v3  ;;  %v594_v8 = vpack.c.bf16 %v270_v7, %v269_v6  ;;  %v368_v9 = vld [vmem:[%s859_s2] ss:$0 sm:$0xff]  ;;  %v271_v14 = vld [vmem:[#allocation7 + $0x70] sm:$0xff]  ;;  %v272_v15 = vld [vmem:[#allocation7 + $0x78] sm:$0xff] }
  0x47   :  { %539 = vmatprep.subr.bf16.mxu0 %v707_v0  ;;  %v597_v16 = vpack.c.bf16 %v272_v15, %v271_v14  ;;  %v369_v17 = vld [vmem:[%s861_s4] ss:$0 sm:$0xff] }
  0x48   :  { %562 = vmatpush3.bf16.msra.mxu1 %v561_v30  ;;  %v370_v21 = vld [vmem:[%s863_s6] ss:$0 sm:$0xff] }
  0x49   :  { %563 = vmatprep.subr.bf16.mxu1 %v707_v0 }
  0x4a   :  { %541 = vmatpush3.bf16.msra.mxu0 %v540_v27 }
  0x4b   :  { %542 = vmatprep.subr.bf16.mxu0 %v707_v0 }
  0x4c   :  { %565 = vmatpush3.bf16.msra.mxu1 %v564_v36 }
  0x4d   :  { %566 = vmatprep.subr.bf16.mxu1 %v707_v0 }
  0x4e   :  { %544 = vmatpush3.bf16.msra.mxu0 %v543_v33 }
  0x4f   :  { %545 = vmatprep.subr.bf16.mxu0 %v707_v0 }
  0x50   :  { %568 = vmatpush3.bf16.msra.mxu1 %v567_v42 }
  0x51   :  { %569 = vmatprep.subr.bf16.mxu1 %v707_v0 }
  0x52   :  { %547 = vmatpush3.bf16.msra.mxu0 %v546_v39 }
  0x53   :  { %548 = vmatprep.subr.bf16.mxu0 %v707_v0 }
  0x54   :  { %571 = vmatpush3.bf16.msra.mxu1 %v570_v46 }
  0x55   :  { %572 = vmatprep.subr.bf16.mxu1 %v707_v0 }
  0x56   :  { %550 = vmatpush3.bf16.msra.mxu0 %v549_v45 }
  0x57   :  { %575 = vmatprep.subr.bf16.mxu0 %v707_v0 }
  0x58   :  { %574 = vmatpush3.bf16.msra.mxu1 %v573_v50 }
  0x59   :  { %455 = vmatmul.mubr.f32.vlgmr.msra.gmra.mrb[0].mxu0 %v68_v47 }
  0x5a   :  { %524 = vmatprep.mubr.msk.f32.mxu0 %vm708_vm0, %v709_v1  ;;  %577 = vmatpush3.bf16.msra.mxu0 %v576_v54  ;;  %v266_v1 = vld [vmem:[#allocation7 + $0x48] sm:$0xff] }
  0x5b   :  { %578 = vmatprep.subr.bf16.mxu0 %v707_v0  ;;  %v588_v2 = vpack.c.bf16 %v266_v1, %v265_v63 }
  0x5e   :  { %580 = vmatpush3.bf16.msra.mxu0 %v579_v56 }
  0x5f   :  { %581 = vmatprep.subr.bf16.mxu0 %v707_v0 }
  0x62   :  { %583 = vmatpush3.bf16.msra.mxu0 %v582_v59 }
  0x63   :  { %584 = vmatprep.subr.bf16.mxu0 %v707_v0 }
  0x66   :  { %586 = vmatpush3.bf16.msra.mxu0 %v585_v62 }
  0x67   :  { %587 = vmatprep.subr.bf16.mxu0 %v707_v0 }
  0x6a   :  { %589 = vmatpush3.bf16.msra.mxu0 %v588_v2 }
  0x6b   :  { %590 = vmatprep.subr.bf16.mxu0 %v707_v0 }
  0x6e   :  { %592 = vmatpush3.bf16.msra.mxu0 %v591_v5 }
  0x6f   :  { %593 = vmatprep.subr.bf16.mxu0 %v707_v0 }
  0x72   :  { %595 = vmatpush3.bf16.msra.mxu0 %v594_v8 }
  0x73   :  { %596 = vmatprep.subr.bf16.mxu0 %v707_v0 }
  0x76   :  { %598 = vmatpush3.bf16.msra.mxu0 %v597_v16 }
 0x12c   :  { %v158_v10 = vpop.f32.mrb[0].mxu0 }
 0x12d   :  { %v159_v11 = vadd.f32 %v368_v9, %v158_v10  ;;  %v456_v12 = vpop.f32.mrb[1].mxu0 }
 0x12f   :  { %v162_v13 = vmax.f32 %v159_v11, 0.0 }
 0x131   :  { %490 = vmatmul.mubr.f32.vlgmr.msra.gmra.mrb[0].mxu1 %v162_v13 }
 0x204   :  { %v252_v18 = vpop.f32.mrb[0].mxu1 }
 0x205   :  { %v253_v19 = vadd.f32 %v369_v17, %v252_v18  ;;  %v491_v0 = vpop.f32.mrb[1].mxu1 }
 0x207   :  { %v256_v20 = vmax.f32 %v253_v19, 0.0 }
 0x209   :  { %525 = vmatmul.mubr.f32.vlgmr.msra.gmra.mrb[2].mxu0 %v256_v20 }
 0x2dc   :  { %v346_v22 = vpop.f32.mrb[2].mxu0 }
 0x2dd   :  { %v347_v23 = vadd.f32 %v370_v21, %v346_v22  ;;  %v526_v24 = vpop.f32.mrb[3].mxu0 }
 0x2df   :  { %v350_v25 = vmax.f32 %v347_v23, 0.0 }
 0x2e1   :  { %351 = vst [vmem:[#allocation8] sm:$0xff] %v350_v25 }
 0x2e2   :  { %685 = shalt.err (!%p682_p0)
}
 0x2e3   :  { %s686_s23 = scalar_lea.hbm %s864_s7, 128 }
 0x2e4   :  { %p687_p1 = scmp.ne.s32.totalorder %s864_s7, %s686_s23  ;;  %p690_p2 = scmp.lt.u32.totalorder %s686_s23, %s864_s7 }
 0x2e6   :  { %p692_p3 = pnand %p690_p2, %p687_p1 }
 0x2e8   :  { %695 = shalt.err (!%p692_p3)
}
 0x2e9   :  { %361 = dma.vmem_to_hbm [thread:$0]  %s359_s20, 128, %s864_s7, [#allocation4]  }
 0x2ea   :  { %700 = dma.done.wait [#allocation4], 128  }
 0x2eb   :  { %701 = vsyncadd [#allocation4], 4294967168 }
 0x2ec   :  { %365 = vsyncpa [#allocation3], 1 }
 0x2ed   :  { %366 = vsyncpa [#allocation6], 1 }
 0x2ee   :  { %367 = vsyncpa [#allocation4], 1 }

</bundles_post_ra>
